<compile_context>
chip_gen: v7x
topology: tpu7x:2x2x1
jax: 0.10.0
libtpu: 0.0.40
codegen_flags: <defaults>
</compile_context>

<pallas_src>
import functools

import jax
import jax.numpy as jnp
from jax import lax
from jax.experimental import pallas as pl
from jax.experimental.pallas import tpu as pltpu


# ---------------------------------------------------------------------------
# Pass 1: stacked 1x1 convs, v accumulation across L tiles, GCN in finalize.
# ---------------------------------------------------------------------------
def _pass1_kernel(x_ref, wsp_ref, bsp_ref, w1_ref, b1_ref, w2_ref,
                  xp_ref, rel_ref, v_acc, *, num_s, true_l, tile_l):
    l = pl.program_id(1)

    @pl.when(l == 0)
    def _():
        v_acc[...] = jnp.zeros_like(v_acc)

    # conv_state and conv_proj fused into one (S+K, C) @ (C, TL) bf16 matmul.
    xb = x_ref[...].astype(jnp.bfloat16)                               # (C, TL)
    sp = lax.dot_general(wsp_ref[...], xb, (((1,), (0,)), ((), ())),
                         preferred_element_type=jnp.float32)
    sp = sp + bsp_ref[...]                                             # (S+K, TL)

    # Zero spatially padded lanes (bias would otherwise leak into v and
    # into the BatchNorm statistics downstream).
    if true_l % tile_l != 0:
        col = l * tile_l + lax.broadcasted_iota(jnp.int32, (1, tile_l), 1)
        sp = jnp.where(col < true_l, sp, 0.0)

    xs = sp[:num_s, :].astype(jnp.bfloat16)                            # (S, TL)
    xp = sp[num_s:, :].astype(jnp.bfloat16)                            # (K, TL)
    xp_ref[...] = xp                                                   # stream to HBM

    # v += x_state @ x_proj^T   (reduction over the L tiles)
    v_acc[...] += lax.dot_general(xs, xp, (((1,), (1,)), ((), ())),
                                  preferred_element_type=jnp.float32)  # (S, K)

    @pl.when(l == pl.num_programs(1) - 1)
    def _():
        # GCN (negligible FLOPs, done once per batch in f32):
        #   h = relu(v @ w1^T + b1 + v);  rel = w2 @ h
        v = v_acc[...]
        h1 = lax.dot_general(v, w1_ref[...], (((1,), (1,)), ((), ())),
                             preferred_element_type=jnp.float32) + b1_ref[...]
        h = jnp.maximum(h1 + v, 0.0)
        rel_ref[...] = lax.dot_general(w2_ref[...], h, (((1,), (0,)), ((), ())),
                                       preferred_element_type=jnp.float32)


# ---------------------------------------------------------------------------
# Pass 2: back-projection + conv_extend per L tile, BN partial statistics.
# ---------------------------------------------------------------------------
def _pass2_kernel(xp_ref, rel_ref, we_ref, y_ref, stats_ref):
    l = pl.program_id(1)

    @pl.when(l == 0)
    def _():
        stats_ref[...] = jnp.zeros_like(stats_ref)

    xp = xp_ref[...]                                                   # (K, TL) bf16
    rel = rel_ref[...].astype(jnp.bfloat16)                            # (S, K)
    xsr = lax.dot_general(rel, xp, (((1,), (0,)), ((), ())),
                          preferred_element_type=jnp.float32)          # (S, TL)
    y = lax.dot_general(we_ref[...], xsr.astype(jnp.bfloat16),
                        (((1,), (0,)), ((), ())),
                        preferred_element_type=jnp.float32)            # (C, TL)
    y_ref[...] = y

    # Per-batch, per-channel partial sums for BatchNorm (padded lanes are
    # exactly zero by construction, so they contribute nothing).
    stats_ref[...] += jnp.concatenate(
        [jnp.sum(y, axis=1, keepdims=True),
         jnp.sum(y * y, axis=1, keepdims=True)], axis=1)               # (C, 2)


# ---------------------------------------------------------------------------
# Pass 3: BatchNorm (folded into scale/shift) + residual add, fully tiled.
# ---------------------------------------------------------------------------
def _bn_residual_kernel(x_ref, y_ref, scale_ref, shift_ref, out_ref):
    out_ref[...] = x_ref[...] + scale_ref[...] * y_ref[...] + shift_ref[...]


def _pick_tile(l_pad, max_tile):
    max_tile = max(128, (max_tile // 128) * 128)
    for cand in range(min(l_pad, max_tile), 0, -128):
        if cand % 128 == 0 and l_pad % cand == 0:
            return cand
    return 128


def glore_unit_forward(x, p, *, max_tile_l=1024):
    """x: (N, C, D, H, W) float32; p: parameter dict (see init_params)."""
    N, C, D, H, W = x.shape
    L = D * H * W
    S = p["w_state"].shape[0]        # num_s = 2 * num_mid
    K = p["w_proj"].shape[0]         # num_n = num_mid

    L_pad = ((L + 127) // 128) * 128
    TL = _pick_tile(L_pad, max_tile_l)
    nL = L_pad // TL

    xf = x.reshape(N, C, L).astype(jnp.float32)
    if L_pad != L:
        xf = jnp.pad(xf, ((0, 0), (0, 0), (0, L_pad - L)))

    # Stack conv_state/conv_proj so one MXU matmul per tile covers both;
    # bf16 operands for the MXU, f32 accumulation / bias / elementwise.
    wsp = jnp.concatenate([p["w_state"], p["w_proj"]], axis=0).astype(jnp.bfloat16)
    bsp = jnp.concatenate([p["b_state"], p["b_proj"]], axis=0).astype(jnp.float32)
    we = p["w_ext"].astype(jnp.bfloat16)

    cparams_acc = pltpu.CompilerParams(
        dimension_semantics=("parallel", "arbitrary"),
        vmem_limit_bytes=48 * 1024 * 1024)

    kernel1 = functools.partial(_pass1_kernel, num_s=S, true_l=L, tile_l=TL)
    xp, rel = pl.pallas_call(
        kernel1,
        out_shape=(jax.ShapeDtypeStruct((N, K, L_pad), jnp.bfloat16),
                   jax.ShapeDtypeStruct((N, S, K), jnp.float32)),
        grid=(N, nL),
        in_specs=[
            pl.BlockSpec((None, C, TL), lambda b, l: (b, 0, l)),   # x tile
            pl.BlockSpec((S + K, C), lambda b, l: (0, 0)),         # stacked conv w
            pl.BlockSpec((S + K, 1), lambda b, l: (0, 0)),         # stacked conv b
            pl.BlockSpec((K, K), lambda b, l: (0, 0)),             # gcn.conv1 w
            pl.BlockSpec((1, K), lambda b, l: (0, 0)),             # gcn.conv1 b
            pl.BlockSpec((S, S), lambda b, l: (0, 0)),             # gcn.conv2 w
        ],
        out_specs=(
            pl.BlockSpec((None, K, TL), lambda b, l: (b, 0, l)),   # x_proj (bf16)
            pl.BlockSpec((None, S, K), lambda b, l: (b, 0, 0)),    # rel (finalize)
        ),
        scratch_shapes=[pltpu.VMEM((S, K), jnp.float32)],
        compiler_params=cparams_acc,
    )(xf, wsp, bsp, p["w_gcn1"], p["b_gcn1"], p["w_gcn2"])

    y, stats = pl.pallas_call(
        _pass2_kernel,
        out_shape=(jax.ShapeDtypeStruct((N, C, L_pad), jnp.float32),
                   jax.ShapeDtypeStruct((N, C, 2), jnp.float32)),
        grid=(N, nL),
        in_specs=[
            pl.BlockSpec((None, K, TL), lambda b, l: (b, 0, l)),   # x_proj stream
            pl.BlockSpec((None, S, K), lambda b, l: (b, 0, 0)),    # rel
            pl.BlockSpec((C, S), lambda b, l: (0, 0)),             # conv_extend w
        ],
        out_specs=(
            pl.BlockSpec((None, C, TL), lambda b, l: (b, 0, l)),   # y
            pl.BlockSpec((None, C, 2), lambda b, l: (b, 0, 0)),    # BN partials
        ),
        compiler_params=cparams_acc,
    )(xp, rel, we)

    # Global (all-batch, all-L) training-mode BatchNorm stats, eps=1e-4,
    # folded into per-channel scale/shift (tiny, plain JAX).
    count = jnp.float32(N * L)
    total = jnp.sum(stats, axis=0)                   # (C, 2)
    mean = total[:, 0] / count
    var = total[:, 1] / count - mean * mean
    inv_std = lax.rsqrt(var + 1e-4)
    gamma = p["gamma"].reshape(C)
    beta = p["beta"].reshape(C)
    scale = (gamma * inv_std).reshape(C, 1)
    shift = (beta - gamma * inv_std * mean).reshape(C, 1)

    out = pl.pallas_call(
        _bn_residual_kernel,
        out_shape=jax.ShapeDtypeStruct((N, C, L_pad), jnp.float32),
        grid=(N, nL),
        in_specs=[
            pl.BlockSpec((None, C, TL), lambda b, l: (b, 0, l)),   # residual x
            pl.BlockSpec((None, C, TL), lambda b, l: (b, 0, l)),   # y
            pl.BlockSpec((C, 1), lambda b, l: (0, 0)),             # scale
            pl.BlockSpec((C, 1), lambda b, l: (0, 0)),             # shift
        ],
        out_specs=pl.BlockSpec((None, C, TL), lambda b, l: (b, 0, l)),
        input_output_aliases={0: 0},   # output reuses the residual buffer
        compiler_params=pltpu.CompilerParams(
            dimension_semantics=("parallel", "parallel"),
            vmem_limit_bytes=48 * 1024 * 1024),
    )(xf, y, scale, shift)

    if L_pad != L:
        out = out[:, :, :L]
    return out.reshape(N, C, D, H, W)


def init_params(key, num_in, num_mid):
    """Deterministic synthetic parameters (PyTorch-like uniform fan-in init)."""
    S = 2 * num_mid   # num_s
    K = num_mid       # num_n
    ks = jax.random.split(key, 8)

    def u(k, shape, fan_in):
        b = 1.0 / jnp.sqrt(fan_in)
        return jax.random.uniform(k, shape, jnp.float32, -b, b)

    return {
        "w_state": u(ks[0], (S, num_in), num_in),
        "b_state": u(ks[1], (S, 1), num_in),
        "w_proj":  u(ks[2], (K, num_in), num_in),
        "b_proj":  u(ks[3], (K, 1), num_in),
        "w_gcn1":  u(ks[4], (K, K), K),
        "b_gcn1":  u(ks[5], (1, K), K),
        "w_gcn2":  u(ks[6], (S, S), S),
        "w_ext":   u(ks[7], (num_in, S), S),
        "gamma":   jnp.ones((1, num_in, 1), jnp.float32),
        "beta":    jnp.zeros((1, num_in, 1), jnp.float32),
        # TODO(synk): BatchNorm running-mean/var buffers (momentum update) are
        # not tracked; training-mode batch statistics are used, as in the spec.
    }


def reference_forward(x, p):
    """Pure-JAX f32 reference for a sanity check."""
    N, C, D, H, W = x.shape
    L = D * H * W
    xf = x.reshape(N, C, L)
    xs = jnp.einsum('sc,ncl->nsl', p['w_state'], xf) + p['b_state'][None]
    xp = jnp.einsum('kc,ncl->nkl', p['w_proj'], xf) + p['b_proj'][None]
    v = jnp.einsum('nsl,nkl->nsk', xs, xp)
    h1 = jnp.einsum('nsj,ij->nsi', v, p['w_gcn1']) + p['b_gcn1'][None]
    h = jnp.maximum(h1 + v, 0.0)
    rel = jnp.einsum('st,ntk->nsk', p['w_gcn2'], h)
    xsr = jnp.einsum('nsk,nkl->nsl', rel, xp)
    y = jnp.einsum('cs,nsl->ncl', p['w_ext'], xsr)
    mean = jnp.mean(y, axis=(0, 2), keepdims=True)
    var = jnp.mean((y - mean) ** 2, axis=(0, 2), keepdims=True)
    out = xf + p['gamma'] * (y - mean) / jnp.sqrt(var + 1e-4) + p['beta']
    return out.reshape(x.shape)


if __name__ == "__main__":
    num_in, num_mid = 4, 2          # -> num_s = 4, num_n = 2
    N, D, H, W = 2, 4, 8, 8         # L = 256

    key = jax.random.PRNGKey(0)
    kx, kp = jax.random.split(key)
    x = jax.random.normal(kx, (N, num_in, D, H, W), jnp.float32)
    params = init_params(kp, num_in, num_mid)

    # max_tile_l=128 -> 2 L-tiles: exercises the cross-tile v / stats
    # accumulation and the pl.when init / finalize paths.
    fwd = jax.jit(functools.partial(glore_unit_forward, max_tile_l=128))
    out = jax.block_until_ready(fwd(x, params))

    ref = reference_forward(x, params)
    assert out.shape == x.shape
    max_err = float(jnp.max(jnp.abs(out - ref)))
    scale = float(jnp.max(jnp.abs(ref)))
    tol = 0.05 * scale + 0.05       # bf16 MXU operands, f32 accumulation
    assert max_err < tol, f"mismatch vs reference: {max_err} (tol {tol})"

    print("KERNEL_OK")
</pallas_src>

<mosaic_0001>
module attributes {stable_mosaic.version = 11 : i64} {
  func.func @_pass1_kernel(%arg0: i32, %arg1: i32, %arg2: memref<1x4x128xf32, #tpu.memory_space<vmem>>, %arg3: memref<6x4xbf16, #tpu.memory_space<vmem>>, %arg4: memref<6x1xf32, #tpu.memory_space<vmem>>, %arg5: memref<2x2xf32, #tpu.memory_space<vmem>>, %arg6: memref<1x2xf32, #tpu.memory_space<vmem>>, %arg7: memref<4x4xf32, #tpu.memory_space<vmem>>, %arg8: memref<1x2x128xbf16, #tpu.memory_space<vmem>>, %arg9: memref<1x4x2xf32, #tpu.memory_space<vmem>>, %arg10: memref<4x2xf32, #tpu.memory_space<vmem>>) attributes {dimension_semantics = [#tpu.dimension_semantics<parallel>, #tpu.dimension_semantics<arbitrary>], iteration_bounds = array<i64: 2, 2>, scalar_prefetch = 0 : i64, scratch_operands = 1 : i64, tpu.core_type = #tpu.core_type<tc>, window_params = [{transform_indices = @transform_0, window_bounds = array<i64: 1, 4, 128>}, {pipeline_mode = #tpu.pipeline_mode<synchronous>, transform_indices = @transform_1, window_bounds = array<i64: 6, 4>}, {pipeline_mode = #tpu.pipeline_mode<synchronous>, transform_indices = @transform_2, window_bounds = array<i64: 6, 1>}, {pipeline_mode = #tpu.pipeline_mode<synchronous>, transform_indices = @transform_3, window_bounds = array<i64: 2, 2>}, {pipeline_mode = #tpu.pipeline_mode<synchronous>, transform_indices = @transform_4, window_bounds = array<i64: 1, 2>}, {pipeline_mode = #tpu.pipeline_mode<synchronous>, transform_indices = @transform_5, window_bounds = array<i64: 4, 4>}, {transform_indices = @transform_6, window_bounds = array<i64: 1, 2, 128>}, {transform_indices = @transform_7, window_bounds = array<i64: 1, 4, 2>}]} {
    %c0_i32 = arith.constant 0 : i32
    %0 = arith.cmpi eq, %arg1, %c0_i32 : i32
    %1 = arith.extui %0 : i1 to i32
    %c0_i32_0 = arith.constant 0 : i32
    %2 = arith.cmpi ne, %1, %c0_i32_0 : i32
    scf.if %2 {
      %cst_16 = arith.constant 0.000000e+00 : f32
      %25 = vector.broadcast %cst_16 : f32 to vector<4x2xf32>
      %c0_17 = arith.constant 0 : index
      %c0_18 = arith.constant 0 : index
      %26 = vector.load %arg10[%c0_17, %c0_18] : memref<4x2xf32, #tpu.memory_space<vmem>>, vector<4x2xf32>
      tpu.vector_store %arg10[%c0_17, %c0_18], %25 {strides = array<i32>} : memref<4x2xf32, #tpu.memory_space<vmem>>, vector<4x2xf32>,
    } else {
    }
    %c0 = arith.constant 0 : index
    %c0_1 = arith.constant 0 : index
    %c0_2 = arith.constant 0 : index
    %3 = vector.load %arg2[%c0, %c0_1, %c0_2] : memref<1x4x128xf32, #tpu.memory_space<vmem>>, vector<1x4x128xf32>
    %4 = vector.shape_cast %3 : vector<1x4x128xf32> to vector<4x128xf32>
    %5 = arith.truncf %4 : vector<4x128xf32> to vector<4x128xbf16>
    %c0_3 = arith.constant 0 : index
    %c0_4 = arith.constant 0 : index
    %6 = vector.load %arg3[%c0_3, %c0_4] : memref<6x4xbf16, #tpu.memory_space<vmem>>, vector<6x4xbf16>
    %cst = arith.constant dense<0.000000e+00> : vector<6x128xf32>
    %7 = tpu.matmul %6, %5, %cst {dimension_numbers = #tpu.dot_dimension_numbers<[1], [0], [0], [1], [0, 0, 1, 1], [], []>} : vector<6x4xbf16>, vector<4x128xbf16>, vector<6x128xf32> -> vector<6x128xf32>
    %c0_5 = arith.constant 0 : index
    %c0_6 = arith.constant 0 : index
    %8 = vector.load %arg4[%c0_5, %c0_6] : memref<6x1xf32, #tpu.memory_space<vmem>>, vector<6x1xf32>
    %9 = vector.broadcast %8 : vector<6x1xf32> to vector<6x128xf32>
    %10 = arith.addf %7, %9 : vector<6x128xf32>
    %11 = vector.extract_strided_slice %10 {offsets = [0, 0], sizes = [4, 128], strides = [1, 1]} : vector<6x128xf32> to vector<4x128xf32>
    %12 = arith.truncf %11 : vector<4x128xf32> to vector<4x128xbf16>
    %13 = vector.extract_strided_slice %10 {offsets = [4, 0], sizes = [2, 128], strides = [1, 1]} : vector<6x128xf32> to vector<2x128xf32>
    %14 = arith.truncf %13 : vector<2x128xf32> to vector<2x128xbf16>
    %c0_7 = arith.constant 0 : index
    %c0_8 = arith.constant 0 : index
    %c0_9 = arith.constant 0 : index
    %15 = vector.load %arg8[%c0_7, %c0_8, %c0_9] : memref<1x2x128xbf16, #tpu.memory_space<vmem>>, vector<1x2x128xbf16>
    %16 = vector.shape_cast %15 : vector<1x2x128xbf16> to vector<2x128xbf16>
    %17 = vector.shape_cast %14 : vector<2x128xbf16> to vector<1x2x128xbf16>
    tpu.vector_store %arg8[%c0_7, %c0_8, %c0_9], %17 {strides = array<i32>} : memref<1x2x128xbf16, #tpu.memory_space<vmem>>, vector<1x2x128xbf16>,
    %c0_10 = arith.constant 0 : index
    %c0_11 = arith.constant 0 : index
    %18 = vector.load %arg10[%c0_10, %c0_11] : memref<4x2xf32, #tpu.memory_space<vmem>>, vector<4x2xf32>
    %cst_12 = arith.constant dense<0.000000e+00> : vector<4x2xf32>
    %19 = tpu.matmul %12, %14, %cst_12 {dimension_numbers = #tpu.dot_dimension_numbers<[1], [1], [0], [0], [0, 0, 1, 0], [], []>} : vector<4x128xbf16>, vector<2x128xbf16>, vector<4x2xf32> -> vector<4x2xf32>
    %20 = arith.addf %18, %19 : vector<4x2xf32>
    %c0_13 = arith.constant 0 : index
    %c0_14 = arith.constant 0 : index
    %21 = vector.load %arg10[%c0_13, %c0_14] : memref<4x2xf32, #tpu.memory_space<vmem>>, vector<4x2xf32>
    tpu.vector_store %arg10[%c0_13, %c0_14], %20 {strides = array<i32>} : memref<4x2xf32, #tpu.memory_space<vmem>>, vector<4x2xf32>,
    %c1_i32 = arith.constant 1 : i32
    %22 = arith.cmpi eq, %arg1, %c1_i32 : i32
    %23 = arith.extui %22 : i1 to i32
    %c0_i32_15 = arith.constant 0 : i32
    %24 = arith.cmpi ne, %23, %c0_i32_15 : i32
    scf.if %24 {
      %c0_16 = arith.constant 0 : index
      %c0_17 = arith.constant 0 : index
      %25 = vector.load %arg10[%c0_16, %c0_17] : memref<4x2xf32, #tpu.memory_space<vmem>>, vector<4x2xf32>
      %c0_18 = arith.constant 0 : index
      %c0_19 = arith.constant 0 : index
      %26 = vector.load %arg5[%c0_18, %c0_19] : memref<2x2xf32, #tpu.memory_space<vmem>>, vector<2x2xf32>
      %cst_20 = arith.constant dense<0.000000e+00> : vector<4x2xf32>
      %27 = tpu.matmul %25, %26, %cst_20 {dimension_numbers = #tpu.dot_dimension_numbers<[1], [1], [0], [0], [0, 0, 1, 0], [], []>} : vector<4x2xf32>, vector<2x2xf32>, vector<4x2xf32> -> vector<4x2xf32>
      %c0_21 = arith.constant 0 : index
      %c0_22 = arith.constant 0 : index
      %28 = vector.load %arg6[%c0_21, %c0_22] : memref<1x2xf32, #tpu.memory_space<vmem>>, vector<1x2xf32>
      %29 = vector.broadcast %28 : vector<1x2xf32> to vector<4x2xf32>
      %30 = arith.addf %27, %29 : vector<4x2xf32>
      %31 = arith.addf %30, %25 : vector<4x2xf32>
      %cst_23 = arith.constant 0.000000e+00 : f32
      %32 = vector.broadcast %cst_23 : f32 to vector<4x2xf32>
      %33 = arith.maximumf %31, %32 : vector<4x2xf32>
      %c0_24 = arith.constant 0 : index
      %c0_25 = arith.constant 0 : index
      %34 = vector.load %arg7[%c0_24, %c0_25] : memref<4x4xf32, #tpu.memory_space<vmem>>, vector<4x4xf32>
      %cst_26 = arith.constant dense<0.000000e+00> : vector<4x2xf32>
      %35 = tpu.matmul %34, %33, %cst_26 {dimension_numbers = #tpu.dot_dimension_numbers<[1], [0], [0], [1], [0, 0, 1, 1], [], []>} : vector<4x4xf32>, vector<4x2xf32>, vector<4x2xf32> -> vector<4x2xf32>
      %c0_27 = arith.constant 0 : index
      %c0_28 = arith.constant 0 : index
      %c0_29 = arith.constant 0 : index
      %36 = vector.load %arg9[%c0_27, %c0_28, %c0_29] : memref<1x4x2xf32, #tpu.memory_space<vmem>>, vector<1x4x2xf32>
      %37 = vector.shape_cast %36 : vector<1x4x2xf32> to vector<4x2xf32>
      %38 = vector.shape_cast %35 : vector<4x2xf32> to vector<1x4x2xf32>
      tpu.vector_store %arg9[%c0_27, %c0_28, %c0_29], %38 {strides = array<i32>} : memref<1x4x2xf32, #tpu.memory_space<vmem>>, vector<1x4x2xf32>,
    } else {
    }
    return
  }
  func.func @transform_0(%arg0: i32, %arg1: i32) -> (i32, i32, i32) {
    %c0_i32 = arith.constant 0 : i32
    %c0_i32_0 = arith.constant 0 : i32
    return %arg0, %c0_i32, %arg1 : i32, i32, i32
  }
  func.func @transform_1(%arg0: i32, %arg1: i32) -> (i32, i32) {
    %c0_i32 = arith.constant 0 : i32
    %c0_i32_0 = arith.constant 0 : i32
    %c0_i32_1 = arith.constant 0 : i32
    return %c0_i32, %c0_i32_0 : i32, i32
  }
  func.func @transform_2(%arg0: i32, %arg1: i32) -> (i32, i32) {
    %c0_i32 = arith.constant 0 : i32
    %c0_i32_0 = arith.constant 0 : i32
    %c0_i32_1 = arith.constant 0 : i32
    return %c0_i32, %c0_i32_0 : i32, i32
  }
  func.func @transform_3(%arg0: i32, %arg1: i32) -> (i32, i32) {
    %c0_i32 = arith.constant 0 : i32
    %c0_i32_0 = arith.constant 0 : i32
    %c0_i32_1 = arith.constant 0 : i32
    return %c0_i32, %c0_i32_0 : i32, i32
  }
  func.func @transform_4(%arg0: i32, %arg1: i32) -> (i32, i32) {
    %c0_i32 = arith.constant 0 : i32
    %c0_i32_0 = arith.constant 0 : i32
    %c0_i32_1 = arith.constant 0 : i32
    return %c0_i32, %c0_i32_0 : i32, i32
  }
  func.func @transform_5(%arg0: i32, %arg1: i32) -> (i32, i32) {
    %c0_i32 = arith.constant 0 : i32
    %c0_i32_0 = arith.constant 0 : i32
    %c0_i32_1 = arith.constant 0 : i32
    return %c0_i32, %c0_i32_0 : i32, i32
  }
  func.func @transform_6(%arg0: i32, %arg1: i32) -> (i32, i32, i32) {
    %c0_i32 = arith.constant 0 : i32
    %c0_i32_0 = arith.constant 0 : i32
    return %arg0, %c0_i32, %arg1 : i32, i32, i32
  }
  func.func @transform_7(%arg0: i32, %arg1: i32) -> (i32, i32, i32) {
    %c0_i32 = arith.constant 0 : i32
    %c0_i32_0 = arith.constant 0 : i32
    %c0_i32_1 = arith.constant 0 : i32
    return %arg0, %c0_i32, %c0_i32_0 : i32, i32, i32
  }
}

module attributes {stable_mosaic.version = 11 : i64} {
  func.func @_pass2_kernel(%arg0: i32, %arg1: i32, %arg2: memref<1x2x128xbf16, #tpu.memory_space<vmem>>, %arg3: memref<1x4x2xf32, #tpu.memory_space<vmem>>, %arg4: memref<4x4xbf16, #tpu.memory_space<vmem>>, %arg5: memref<1x4x128xf32, #tpu.memory_space<vmem>>, %arg6: memref<1x4x2xf32, #tpu.memory_space<vmem>>) attributes {dimension_semantics = [#tpu.dimension_semantics<parallel>, #tpu.dimension_semantics<arbitrary>], iteration_bounds = array<i64: 2, 2>, scalar_prefetch = 0 : i64, scratch_operands = 0 : i64, tpu.core_type = #tpu.core_type<tc>, window_params = [{transform_indices = @transform_0, window_bounds = array<i64: 1, 2, 128>}, {transform_indices = @transform_1, window_bounds = array<i64: 1, 4, 2>}, {pipeline_mode = #tpu.pipeline_mode<synchronous>, transform_indices = @transform_2, window_bounds = array<i64: 4, 4>}, {transform_indices = @transform_3, window_bounds = array<i64: 1, 4, 128>}, {transform_indices = @transform_4, window_bounds = array<i64: 1, 4, 2>}]} {
    %c0_i32 = arith.constant 0 : i32
    %0 = arith.cmpi eq, %arg1, %c0_i32 : i32
    %1 = arith.extui %0 : i1 to i32
    %c0_i32_0 = arith.constant 0 : i32
    %2 = arith.cmpi ne, %1, %c0_i32_0 : i32
    scf.if %2 {
      %cst_20 = arith.constant 0.000000e+00 : f32
      %27 = vector.broadcast %cst_20 : f32 to vector<4x2xf32>
      %c0_21 = arith.constant 0 : index
      %c0_22 = arith.constant 0 : index
      %c0_23 = arith.constant 0 : index
      %28 = vector.load %arg6[%c0_21, %c0_22, %c0_23] : memref<1x4x2xf32, #tpu.memory_space<vmem>>, vector<1x4x2xf32>
      %29 = vector.shape_cast %28 : vector<1x4x2xf32> to vector<4x2xf32>
      %30 = vector.shape_cast %27 : vector<4x2xf32> to vector<1x4x2xf32>
      tpu.vector_store %arg6[%c0_21, %c0_22, %c0_23], %30 {strides = array<i32>} : memref<1x4x2xf32, #tpu.memory_space<vmem>>, vector<1x4x2xf32>,
    } else {
    }
    %c0 = arith.constant 0 : index
    %c0_1 = arith.constant 0 : index
    %c0_2 = arith.constant 0 : index
    %3 = vector.load %arg2[%c0, %c0_1, %c0_2] : memref<1x2x128xbf16, #tpu.memory_space<vmem>>, vector<1x2x128xbf16>
    %4 = vector.shape_cast %3 : vector<1x2x128xbf16> to vector<2x128xbf16>
    %c0_3 = arith.constant 0 : index
    %c0_4 = arith.constant 0 : index
    %c0_5 = arith.constant 0 : index
    %5 = vector.load %arg3[%c0_3, %c0_4, %c0_5] : memref<1x4x2xf32, #tpu.memory_space<vmem>>, vector<1x4x2xf32>
    %6 = vector.shape_cast %5 : vector<1x4x2xf32> to vector<4x2xf32>
    %7 = arith.truncf %6 : vector<4x2xf32> to vector<4x2xbf16>
    %cst = arith.constant dense<0.000000e+00> : vector<4x128xf32>
    %8 = tpu.matmul %7, %4, %cst {dimension_numbers = #tpu.dot_dimension_numbers<[1], [0], [0], [1], [0, 0, 1, 1], [], []>} : vector<4x2xbf16>, vector<2x128xbf16>, vector<4x128xf32> -> vector<4x128xf32>
    %c0_6 = arith.constant 0 : index
    %c0_7 = arith.constant 0 : index
    %9 = vector.load %arg4[%c0_6, %c0_7] : memref<4x4xbf16, #tpu.memory_space<vmem>>, vector<4x4xbf16>
    %10 = arith.truncf %8 : vector<4x128xf32> to vector<4x128xbf16>
    %cst_8 = arith.constant dense<0.000000e+00> : vector<4x128xf32>
    %11 = tpu.matmul %9, %10, %cst_8 {dimension_numbers = #tpu.dot_dimension_numbers<[1], [0], [0], [1], [0, 0, 1, 1], [], []>} : vector<4x4xbf16>, vector<4x128xbf16>, vector<4x128xf32> -> vector<4x128xf32>
    %c0_9 = arith.constant 0 : index
    %c0_10 = arith.constant 0 : index
    %c0_11 = arith.constant 0 : index
    %12 = vector.load %arg5[%c0_9, %c0_10, %c0_11] : memref<1x4x128xf32, #tpu.memory_space<vmem>>, vector<1x4x128xf32>
    %13 = vector.shape_cast %12 : vector<1x4x128xf32> to vector<4x128xf32>
    %14 = vector.shape_cast %11 : vector<4x128xf32> to vector<1x4x128xf32>
    tpu.vector_store %arg5[%c0_9, %c0_10, %c0_11], %14 {strides = array<i32>} : memref<1x4x128xf32, #tpu.memory_space<vmem>>, vector<1x4x128xf32>,
    %c0_12 = arith.constant 0 : index
    %c0_13 = arith.constant 0 : index
    %c0_14 = arith.constant 0 : index
    %15 = vector.load %arg6[%c0_12, %c0_13, %c0_14] : memref<1x4x2xf32, #tpu.memory_space<vmem>>, vector<1x4x2xf32>
    %16 = vector.shape_cast %15 : vector<1x4x2xf32> to vector<4x2xf32>
    %cst_15 = arith.constant dense<0.000000e+00> : vector<4xf32>
    %17 = vector.multi_reduction <add>, %11, %cst_15 [1] : vector<4x128xf32> to vector<4xf32>
    %18 = vector.shape_cast %17 : vector<4xf32> to vector<4x1xf32>
    %19 = arith.mulf %11, %11 : vector<4x128xf32>
    %cst_16 = arith.constant dense<0.000000e+00> : vector<4xf32>
    %20 = vector.multi_reduction <add>, %19, %cst_16 [1] : vector<4x128xf32> to vector<4xf32>
    %21 = vector.shape_cast %20 : vector<4xf32> to vector<4x1xf32>
    %22 = tpu.concatenate %18, %21 in 1 : vector<4x1xf32>, vector<4x1xf32> -> vector<4x2xf32>
    %23 = arith.addf %16, %22 : vector<4x2xf32>
    %c0_17 = arith.constant 0 : index
    %c0_18 = arith.constant 0 : index
    %c0_19 = arith.constant 0 : index
    %24 = vector.load %arg6[%c0_17, %c0_18, %c0_19] : memref<1x4x2xf32, #tpu.memory_space<vmem>>, vector<1x4x2xf32>
    %25 = vector.shape_cast %24 : vector<1x4x2xf32> to vector<4x2xf32>
    %26 = vector.shape_cast %23 : vector<4x2xf32> to vector<1x4x2xf32>
    tpu.vector_store %arg6[%c0_17, %c0_18, %c0_19], %26 {strides = array<i32>} : memref<1x4x2xf32, #tpu.memory_space<vmem>>, vector<1x4x2xf32>,
    return
  }
  func.func @transform_0(%arg0: i32, %arg1: i32) -> (i32, i32, i32) {
    %c0_i32 = arith.constant 0 : i32
    %c0_i32_0 = arith.constant 0 : i32
    return %arg0, %c0_i32, %arg1 : i32, i32, i32
  }
  func.func @transform_1(%arg0: i32, %arg1: i32) -> (i32, i32, i32) {
    %c0_i32 = arith.constant 0 : i32
    %c0_i32_0 = arith.constant 0 : i32
    %c0_i32_1 = arith.constant 0 : i32
    return %arg0, %c0_i32, %c0_i32_0 : i32, i32, i32
  }
  func.func @transform_2(%arg0: i32, %arg1: i32) -> (i32, i32) {
    %c0_i32 = arith.constant 0 : i32
    %c0_i32_0 = arith.constant 0 : i32
    %c0_i32_1 = arith.constant 0 : i32
    return %c0_i32, %c0_i32_0 : i32, i32
  }
  func.func @transform_3(%arg0: i32, %arg1: i32) -> (i32, i32, i32) {
    %c0_i32 = arith.constant 0 : i32
    %c0_i32_0 = arith.constant 0 : i32
    return %arg0, %c0_i32, %arg1 : i32, i32, i32
  }
  func.func @transform_4(%arg0: i32, %arg1: i32) -> (i32, i32, i32) {
    %c0_i32 = arith.constant 0 : i32
    %c0_i32_0 = arith.constant 0 : i32
    %c0_i32_1 = arith.constant 0 : i32
    return %arg0, %c0_i32, %c0_i32_0 : i32, i32, i32
  }
}

module attributes {stable_mosaic.version = 11 : i64} {
  func.func @_bn_residual_kernel(%arg0: i32, %arg1: i32, %arg2: memref<1x4x128xf32, #tpu.memory_space<vmem>>, %arg3: memref<1x4x128xf32, #tpu.memory_space<vmem>>, %arg4: memref<4x1xf32, #tpu.memory_space<vmem>>, %arg5: memref<4x1xf32, #tpu.memory_space<vmem>>, %arg6: memref<1x4x128xf32, #tpu.memory_space<vmem>>) attributes {dimension_semantics = [#tpu.dimension_semantics<parallel>, #tpu.dimension_semantics<parallel>], iteration_bounds = array<i64: 2, 2>, scalar_prefetch = 0 : i64, scratch_operands = 0 : i64, tpu.core_type = #tpu.core_type<tc>, window_params = [{transform_indices = @transform_0, window_bounds = array<i64: 1, 4, 128>}, {transform_indices = @transform_1, window_bounds = array<i64: 1, 4, 128>}, {pipeline_mode = #tpu.pipeline_mode<synchronous>, transform_indices = @transform_2, window_bounds = array<i64: 4, 1>}, {pipeline_mode = #tpu.pipeline_mode<synchronous>, transform_indices = @transform_3, window_bounds = array<i64: 4, 1>}, {transform_indices = @transform_4, window_bounds = array<i64: 1, 4, 128>}]} {
    %c0 = arith.constant 0 : index
    %c0_0 = arith.constant 0 : index
    %c0_1 = arith.constant 0 : index
    %0 = vector.load %arg2[%c0, %c0_0, %c0_1] : memref<1x4x128xf32, #tpu.memory_space<vmem>>, vector<1x4x128xf32>
    %1 = vector.shape_cast %0 : vector<1x4x128xf32> to vector<4x128xf32>
    %c0_2 = arith.constant 0 : index
    %c0_3 = arith.constant 0 : index
    %2 = vector.load %arg4[%c0_2, %c0_3] : memref<4x1xf32, #tpu.memory_space<vmem>>, vector<4x1xf32>
    %c0_4 = arith.constant 0 : index
    %c0_5 = arith.constant 0 : index
    %c0_6 = arith.constant 0 : index
    %3 = vector.load %arg3[%c0_4, %c0_5, %c0_6] : memref<1x4x128xf32, #tpu.memory_space<vmem>>, vector<1x4x128xf32>
    %4 = vector.shape_cast %3 : vector<1x4x128xf32> to vector<4x128xf32>
    %5 = vector.broadcast %2 : vector<4x1xf32> to vector<4x128xf32>
    %6 = arith.mulf %5, %4 : vector<4x128xf32>
    %7 = arith.addf %1, %6 : vector<4x128xf32>
    %c0_7 = arith.constant 0 : index
    %c0_8 = arith.constant 0 : index
    %8 = vector.load %arg5[%c0_7, %c0_8] : memref<4x1xf32, #tpu.memory_space<vmem>>, vector<4x1xf32>
    %9 = vector.broadcast %8 : vector<4x1xf32> to vector<4x128xf32>
    %10 = arith.addf %7, %9 : vector<4x128xf32>
    %c0_9 = arith.constant 0 : index
    %c0_10 = arith.constant 0 : index
    %c0_11 = arith.constant 0 : index
    %11 = vector.load %arg6[%c0_9, %c0_10, %c0_11] : memref<1x4x128xf32, #tpu.memory_space<vmem>>, vector<1x4x128xf32>
    %12 = vector.shape_cast %11 : vector<1x4x128xf32> to vector<4x128xf32>
    %13 = vector.shape_cast %10 : vector<4x128xf32> to vector<1x4x128xf32>
    tpu.vector_store %arg6[%c0_9, %c0_10, %c0_11], %13 {strides = array<i32>} : memref<1x4x128xf32, #tpu.memory_space<vmem>>, vector<1x4x128xf32>,
    return
  }
  func.func @transform_0(%arg0: i32, %arg1: i32) -> (i32, i32, i32) {
    %c0_i32 = arith.constant 0 : i32
    %c0_i32_0 = arith.constant 0 : i32
    return %arg0, %c0_i32, %arg1 : i32, i32, i32
  }
  func.func @transform_1(%arg0: i32, %arg1: i32) -> (i32, i32, i32) {
    %c0_i32 = arith.constant 0 : i32
    %c0_i32_0 = arith.constant 0 : i32
    return %arg0, %c0_i32, %arg1 : i32, i32, i32
  }
  func.func @transform_2(%arg0: i32, %arg1: i32) -> (i32, i32) {
    %c0_i32 = arith.constant 0 : i32
    %c0_i32_0 = arith.constant 0 : i32
    %c0_i32_1 = arith.constant 0 : i32
    return %c0_i32, %c0_i32_0 : i32, i32
  }
  func.func @transform_3(%arg0: i32, %arg1: i32) -> (i32, i32) {
    %c0_i32 = arith.constant 0 : i32
    %c0_i32_0 = arith.constant 0 : i32
    %c0_i32_1 = arith.constant 0 : i32
    return %c0_i32, %c0_i32_0 : i32, i32
  }
  func.func @transform_4(%arg0: i32, %arg1: i32) -> (i32, i32, i32) {
    %c0_i32 = arith.constant 0 : i32
    %c0_i32_0 = arith.constant 0 : i32
    return %arg0, %c0_i32, %arg1 : i32, i32, i32
  }
}

</mosaic_0001>

<bundles_post_ra>
// kernel: glore_unit_forward.5
= control target key start
LH: loop header
LB: loop body
LE: loop exit
PB: predicated region body
PF: predicated region fallthrough
CT: control target
= control target key end

     0   :  { %s503_s15 = smov 0   ;;  %s505_s16 = smov 0   ;;  %s563_s0 = inlined_call_operand.vmem [shape: f32[2,4,256], index: 0, kind: input, shape index: {}, may-alias: {0,4}]   ;;  %s564_s1 = inlined_call_operand.vmem [shape: f32[2,4,256], index: 1, kind: input, shape index: {}]   ;;  %s565_s2 = inlined_call_operand.vmem [shape: f32[4,1], index: 2, kind: input, shape index: {}]   ;;  %s566_s3 = inlined_call_operand.vmem [shape: f32[4,1], index: 3, kind: input, shape index: {}]   ;;  %s567_s4 = inlined_call_operand.vmem [shape: f32[2,4,256], index: 4, kind: output, shape index: {}, may-alias: {0,4}]  }
   0x1   :  { %s507_s17 = smov 0   ;;  %s509_s18 = smov 0  }
   0x2   :  { %s511_s19 = smov 0  }
   0x3 LB: > { %s23_s20 = sadd.s32 1, %s467_s17  ;;  %s26_s21 = sadd.s32 1, %s471_s18  ;;  %s475_s19 = sphi %s511_s19, %s14_s19   ;;  %s471_s18 = sphi %s509_s18, %s571_s18   ;;  %s467_s17 = sphi %s507_s17, %s570_s17   ;;  %s463_s16 = sphi %s505_s16, %s569_s16   ;;  %s459_s15 = sphi %s503_s15, %s568_s15  }
   0x4   : > { %p24_p0 = scmp.ge.s32.totalorder %s23_s20, 2  ;;  %p386_p1 = scmp.ge.s32.totalorder %s475_s19, 1 }
   0x5   : > { %p196_p2 = scmp.lt.s32.totalorder %s475_s19, 5 }
   0x6   : > { %s573_s20 = smov (%p24_p0, %s23_s20), 0  ;;  %s575_s21 = smov (!%p24_p0, %s26_s21), %s471_s18 }
   0x7   : > { %p197_p3 = pnand %p386_p1, %p196_p2  ;;  %p28_p4 = scmp.ge.s32.totalorder %s575_s21, 2 }
   0x8   : > { %v261_v0 = vld [vmem:[%s565_s2] sm:$0xf] (!%p197_p3)  ;;  %v477_v1 = vmov (!%p197_p3), 0   ;;  %p236_p5 = scmp.lt.s32.totalorder (!%p197_p3), %s463_s16, 1  ;;  %p238_p6 = scmp.lt.s32.totalorder (!%p197_p3), %s459_s15, 1 }
   0x9   : > { %s577_s21 = smov (%p28_p4, %s575_s21), 0  ;;  %200 = sbr.rel (%p197_p3) target bundleno = 146 (0x92), region = 36 }
   0xa   : > { %436 = vset.pattern.permute.xlu0 (!%p197_p3), %v477_v1  ;;  %v270_v2 = vld [vmem:[%s566_s3] sm:$0xf] (!%p197_p3) }
   0xb   : > { %265 = vperm.xlu0 (!%p197_p3), %436, %v261_v0  }
   0xf   : > { %273 = vperm.xlu0 (!%p197_p3), %436, %v270_v2  }
  0x10   : > { %s579_s16 = smov (!%p236_p5, %s463_s16), 1  ;;  %s581_s15 = smov (!%p238_p6, %s459_s15), 1 }
  0x11   : > { %s387_s26 = sshll.u32 %s579_s16, 1 }
  0x12   : > { %s241_s27 = sadd.s32 %s387_s26, %s581_s15 }
  0x13   : > { %s388_s28 = sshll.u32 %s241_s27, 2 }
  0x14   : > { %s251_s5 = scalar_lea.vmem %s564_s1, %s388_s28  ;;  %s243_s8 = scalar_lea.vmem %s563_s0, %s388_s28 }
  0x15   : > { %v262_v3 = vld [vmem:[%s251_s5] sm:$0xf]  ;;  %s259_s11 = scalar_lea.vmem %s567_s4, %s388_s28 }
  0x16   : > { %v260_v5 = vld [vmem:[%s243_s8] sm:$0xf] }
  0x8a   : > { %v266_v4 = vpop.permute.xlu0 %265 }
  0x8b   : > { %v268_v6 = vmul.f32 %v266_v4, %v262_v3 }
  0x8d   : > { %v269_v7 = vadd.f32 %v268_v6, %v260_v5 }
  0x8e   : > { %v274_v8 = vpop.permute.xlu0 %273 }
  0x8f   : > { %v276_v9 = vadd.f32 %v274_v8, %v269_v7 }
  0x91   : > { %277 = vst [vmem:[%s259_s11] sm:$0xf] %v276_v9 }
  0x92 PF: > { %s14_s19 = sadd.s32 1, %s475_s19   ;;  %s568_s15 = smov %s467_s17 }
  0x93   : > { %p11_p7 = scmp.ge.s32.totalorder %s14_s19, 6   ;;  %s569_s16 = smov %s471_s18 }
  0x94   : > { %s570_s17 = smov %s573_s20  ;;  %s571_s18 = smov %s577_s21 }
  0x95   :  { %13 = sbr.rel (!%p11_p7) target bundleno = 3 (0x3), region = 69 }

// kernel: glore_unit_forward.4
= control target key start
LH: loop header
LB: loop body
LE: loop exit
PB: predicated region body
PF: predicated region fallthrough
CT: control target
= control target key end

     0   :  { %s645_s15 = smov 0   ;;  %s647_s16 = smov 0   ;;  %s713_s0 = inlined_call_operand.vmem [shape: bf16[2,2,256], index: 0, kind: input, shape index: {}]   ;;  %s714_s1 = inlined_call_operand.vmem [shape: f32[2,4,2], index: 1, kind: input, shape index: {}]   ;;  %s715_s2 = inlined_call_operand.vmem [shape: bf16[4,4], index: 2, kind: input, shape index: {}]   ;;  %s716_s3 = inlined_call_operand.vmem [shape: f32[2,4,256], index: 3, kind: output, shape index: {0}]   ;;  %s717_s4 = inlined_call_operand.vmem [shape: f32[2,4,2], index: 4, kind: output, shape index: {1}]  }
   0x1   :  { %s649_s17 = smov 0   ;;  %s651_s18 = smov 0  }
   0x2   :  { %s653_s19 = smov 0  }
   0x3 LB: > { %s24_s20 = sadd.s32 1, %s607_s17  ;;  %s27_s21 = sadd.s32 1, %s611_s18  ;;  %s615_s19 = sphi %s653_s19, %s15_s19   ;;  %s611_s18 = sphi %s651_s18, %s721_s18   ;;  %s607_s17 = sphi %s649_s17, %s720_s17   ;;  %s603_s16 = sphi %s647_s16, %s719_s16   ;;  %s599_s15 = sphi %s645_s15, %s718_s15  }
   0x4   : > { %p25_p0 = scmp.ge.s32.totalorder %s24_s20, 2  ;;  %p507_p1 = scmp.ge.s32.totalorder %s615_s19, 1 }
   0x5   : > { %p192_p2 = scmp.lt.s32.totalorder %s615_s19, 5 }
   0x6   : > { %s723_s20 = smov (%p25_p0, %s24_s20), 0  ;;  %s725_s21 = smov (!%p25_p0, %s27_s21), %s611_s18 }
   0x7   : > { %p193_p3 = pnand %p507_p1, %p192_p2  ;;  %p29_p4 = scmp.ge.s32.totalorder %s725_s21, 2 }
   0x8   : > { %p231_p5 = scmp.lt.s32.totalorder (!%p193_p3), %s603_s16, 1  ;;  %p233_p6 = scmp.lt.s32.totalorder (!%p193_p3), %s599_s15, 1 }
   0x9   : > { %s727_s21 = smov (%p29_p4, %s725_s21), 0  ;;  %196 = sbr.rel (%p193_p3) target bundleno = 609 (0x261), region = 32 }
   0xa   : > { %p513_p7 = scmp.ne.s32.totalorder (!%p193_p3), %s599_s15, 0 }
  0x10   : > { %s729_s16 = smov (!%p231_p5, %s603_s16), 1  ;;  %258 = sbr.rel (%p513_p7) target bundleno = 23 (0x17), region = 36 }
  0x11   : > { %s234_s22 = scalar_select %p233_p6, %s599_s15, 1 }
  0x12   : > { %s508_s23 = sshll.u32 %s729_s16, 1  ;;  %s509_s24 = sshll.u32 %s729_s16, 2  ;;  %vm259_vm0 = vcmask (!%p513_p7), 11264   ;;  %v617_v0 = vmov (!%p513_p7), 0.0  }
  0x13   : > { %s236_s25 = sadd.s32 %s508_s23, %s234_s22  ;;  %s241_s28 = scalar_lea.vmem %s714_s1, %s509_s24 }
  0x14   : > { %s237_s5 = scalar_lea.vmem %s713_s0, %s236_s25  ;;  %s511_s6 = sshll.u32 %s236_s25, 2 }
  0x15   : > { %s684_s9 = scalar_lea.vmem %s716_s3, %s511_s6  ;;  %s689_s12 = scalar_lea.vmem %s717_s4, %s509_s24 }
  0x16   : > { %260 = vst.msk [vmem:[%s689_s12] sm:$0xf] (!%p513_p7), %vm259_vm0, %v617_v0 }
  0x17 PF: > { %v261_v1 = vld [vmem:[%s237_s5] sm:$0x1]  ;;  %vm268_vm1 = vcmask 1040384   ;;  %v618_v2 = vmov 0.0   ;;  %vm619_vm2 = vmmov 0   ;;  %vm264_vm3 = vcmask 15360  }
  0x18   : > { %522 = vmatprep.subr.bf16.mxu0 %v618_v2  ;;  %v270_v3 = vsel %vm268_vm1, %v261_v1, 0  ;;  %524 = vmatprep.mubr.msk.bf16.mxu0 %vm619_vm2, %v618_v2  ;;  %v262_v4 = vld [vmem:[%s241_s28] sm:$0xf]  ;;  %vm318_vm4 = vcmask 1041408   ;;  %vm314_vm5 = vcmask 31744   ;;  %vm364_vm6 = vcmask 1043456  }
  0x19   : > { %523 = vmatpush3.bf16.msra.mxu0 %v270_v3  ;;  %v263_v5 = vpack.c.bf16 %v262_v4, %v262_v4  ;;  %528 = vmatprep.subr.bf16.mxu1 %v618_v2  ;;  %v312_v12 = vld [vmem:[%s715_s2] sm:$0x3]  ;;  %vm372_vm7 = vcmask 7168   ;;  %vm375_vm8 = vcmask 11264  }
  0x1a   : > { %530 = vmatprep.mubr.msk.bf16.mxu1 %vm619_vm2, %v618_v2 }
  0x1c   : > { %525 = vmatmul.mubr.msk.bf16.vlgmr.msra.gmra.mrb[0].mxu0 %vm264_vm3, %v263_v5 }
  0x1d   : > { %v363_v21 = vld [vmem:[%s689_s12] sm:$0xf] }
  0xef   : > { %v306_v6 = vpop.f32.mrb[0].mxu0 }
  0xf0   : > { %v313_v7 = vpack.c.bf16 %v306_v6, %v306_v6  ;;  %v526_v8 = vpop.f32.mrb[1].mxu0 }
  0xf1   : > { %v309_v9 = vpop.f32.mrb[2].mxu0 }
  0xf2   : > { %v527_v10 = vpop.f32.mrb[3].mxu0  ;;  %v320_v11 = vsel %vm318_vm4, %v313_v7, 0 }
  0xf3   : > { %529 = vmatpush3.bf16.msra.mxu1 %v320_v11 }
  0xf6   : > { %531 = vmatmul.mubr.msk.bf16.vlgmr.msra.gmra.mrb[0].mxu1 %vm314_vm5, %v312_v12 }
 0x1c9   : > { %v356_v13 = vpop.f32.mrb[0].mxu1 }
 0x1ca   : > { %362 = vst [vmem:[%s684_s9] sm:$0xf] %v356_v13  ;;  %v532_v14 = vpop.f32.mrb[1].mxu1  ;;  %v365_v15 = vsel %vm364_vm6, %v356_v13, 0.0  ;;  %v368_v16 = vmul.f32 %v356_v13, %v356_v13 }
 0x1cb   : > { %366 = vadd.xlane.f32.xlu0 %v365_v15  ;;  %v359_v17 = vpop.f32.mrb[2].mxu1 }
 0x1cc   : > { %v533_v18 = vpop.f32.mrb[3].mxu1  ;;  %v369_v19 = vsel %vm364_vm6, %v368_v16, 0.0 }
 0x1cf   : > { %370 = vadd.xlane.f32.xlu0 %v369_v19 }
 0x258   : > { %v367_v20 = vpop.xlane.xlu0 %366 }
 0x25c   : > { %v371_v22 = vpop.xlane.xlu0 %370 }
 0x25d   : > { %v373_v23 = vsel %vm372_vm7, %v367_v20, %v371_v22 }
 0x25e   : > { %v374_v24 = vadd.f32 %v373_v23, %v363_v21 }
 0x260   : > { %376 = vst.msk [vmem:[%s689_s12] sm:$0xf] %vm375_vm8, %v374_v24 }
 0x261 PF: > { %s15_s19 = sadd.s32 1, %s615_s19   ;;  %s718_s15 = smov %s607_s17 }
 0x262   : > { %p12_p8 = scmp.ge.s32.totalorder %s15_s19, 6   ;;  %s719_s16 = smov %s611_s18 }
 0x263   : > { %s720_s17 = smov %s723_s20  ;;  %s721_s18 = smov %s727_s21 }
 0x264   :  { %14 = sbr.rel (!%p12_p8) target bundleno = 3 (0x3), region = 81 }

// kernel: glore_unit_forward.3
= control target key start
LH: loop header
LB: loop body
LE: loop exit
PB: predicated region body
PF: predicated region fallthrough
CT: control target
= control target key end

     0   :  { %s914_s24 = smov 0   ;;  %s916_s25 = smov 0   ;;  %s1005_s0 = inlined_call_operand.vmem [shape: f32[2,4,256], index: 0, kind: input, shape index: {}]   ;;  %s1006_s1 = inlined_call_operand.vmem [shape: bf16[6,4], index: 1, kind: input, shape index: {}]   ;;  %s1007_s2 = inlined_call_operand.vmem [shape: f32[6,1], index: 2, kind: input, shape index: {}]   ;;  %s1008_s3 = inlined_call_operand.vmem [shape: f32[2,2], index: 3, kind: input, shape index: {}]   ;;  %s1009_s4 = inlined_call_operand.vmem [shape: f32[1,2], index: 4, kind: input, shape index: {}]   ;;  %s1010_s5 = inlined_call_operand.vmem [shape: f32[4,4], index: 5, kind: input, shape index: {}]   ;;  %s1011_s6 = inlined_call_operand.vmem [shape: bf16[2,2,256], index: 6, kind: output, shape index: {0}]   ;;  %s1012_s7 = inlined_call_operand.vmem [shape: f32[2,4,2], index: 7, kind: output, shape index: {1}]  }
   0x1   :  { %s918_s26 = smov 0   ;;  %s920_s27 = smov 0  }
   0x2   :  { %s922_s28 = smov 0  }
   0x3 LB: > { %s27_s29 = sadd.s32 1, %s857_s26  ;;  %s30_s30 = sadd.s32 1, %s861_s27  ;;  %s865_s28 = sphi %s922_s28, %s18_s28   ;;  %s861_s27 = sphi %s920_s27, %s1016_s27   ;;  %s857_s26 = sphi %s918_s26, %s1015_s26   ;;  %s853_s25 = sphi %s916_s25, %s1014_s25   ;;  %s849_s24 = sphi %s914_s24, %s1013_s24  }
   0x4   : > { %p28_p0 = scmp.ge.s32.totalorder %s27_s29, 2  ;;  %p734_p1 = scmp.ge.s32.totalorder %s865_s28, 1 }
   0x5   : > { %p259_p2 = scmp.lt.s32.totalorder %s865_s28, 5 }
   0x6   : > { %s1018_s29 = smov (%p28_p0, %s27_s29), 0  ;;  %s1020_s30 = smov (!%p28_p0, %s30_s30), %s861_s27 }
   0x7   : > { %p260_p3 = pnand %p734_p1, %p259_p2  ;;  %p32_p4 = scmp.ge.s32.totalorder %s1020_s30, 2 }
   0x8   : > { %p300_p5 = scmp.lt.s32.totalorder (!%p260_p3), %s853_s25, 1  ;;  %p302_p6 = scmp.lt.s32.totalorder (!%p260_p3), %s849_s24, 1 }
   0x9   : > { %s1022_s30 = smov (%p32_p4, %s1020_s30), 0  ;;  %263 = sbr.rel (%p260_p3) target bundleno = 909 (0x38d), region = 44 }
   0xa   : > { %p739_p7 = scmp.ne.s32.totalorder (!%p260_p3), %s849_s24, 0 }
  0x10   : > { %s1024_s25 = smov (!%p300_p5, %s853_s25), 1  ;;  %323 = sbr.rel (%p739_p7) target bundleno = 23 (0x17), region = 48 }
  0x11   : > { %s303_s8 = scalar_select %p302_p6, %s849_s24, 1 }
  0x12   : > { %s735_s9 = sshll.u32 %s1024_s25, 1  ;;  %s738_s10 = sshll.u32 %s1024_s25, 2  ;;  %vm324_vm0 = vcmask (!%p739_p7), 11264   ;;  %v867_v0 = vmov (!%p739_p7), 0.0  }
  0x13   : > { %s948_s11 = sadd.s32 %s735_s9, %s303_s8  ;;  %s953_s14 = scalar_lea.vmem %s1012_s7, %s738_s10  ;;  %325 = vst.msk [vmem:[#allocation2] sm:$0xf] (!%p739_p7), %vm324_vm0, %v867_v0 }
  0x14   : > { %s736_s15 = sshll.u32 %s948_s11, 2  ;;  %s314_s18 = scalar_lea.vmem %s1011_s6, %s948_s11 }
  0x15   : > { %s307_s21 = scalar_lea.vmem %s1005_s0, %s736_s15 }
  0x17 PF: > { %v326_v1 = vld [vmem:[%s307_s21] sm:$0xf]  ;;  %vm339_vm1 = vcmask 1041408   ;;  %v868_v2 = vmov 0.0   ;;  %vm869_vm2 = vmmov 0   ;;  %v870_v5 = vmov 0  }
  0x18   : > { %757 = vmatprep.subr.bf16.mxu0 %v868_v2  ;;  %v327_v3 = vpack.c.bf16 %v326_v1, %v326_v1  ;;  %759 = vmatprep.mubr.msk.bf16.mxu0 %vm869_vm2, %v868_v2  ;;  %v329_v4 = vld [vmem:[%s1007_s2] sm:$0x3f]  ;;  %vm335_vm3 = vcmask 31744   ;;  %v871_v8 = vmov 1966171168   ;;  %v388_v10 = vlaneseq  ;;  %p741_p8 = scmp.ne.s32.totalorder %s849_s24, 1 }
  0x19   : > { %826 = vset.pattern.permute.xlu0 %v870_v5  ;;  %763 = vmatprep.subr.bf16.mxu1 %v868_v2  ;;  %v328_v7 = vld [vmem:[%s1006_s1] sm:$0x7]  ;;  %v386_v9 = vunpack.c.l.s4 %v871_v8  ;;  %vm446_vm4 = vcmask 11264   ;;  %vm461_vm5 = vcmask (!%p741_p8), 15360   ;;  %v872_v32 = vmov (!%p741_p8), 0.0  }
  0x1a   : > { %v341_v6 = vsel %vm339_vm1, %v327_v3, 0  ;;  %332 = vperm.xlu0 %826, %v329_v4   ;;  %765 = vmatprep.mubr.msk.bf16.mxu1 %vm869_vm2, %v868_v2  ;;  %v389_v12 = vshrl.u32 %v388_v10, 7  ;;  %v402_v25 = vld [vmem:[#allocation2] sm:$0xf]  ;;  %vm873_vm6 = vmmov (!%p741_p8), 0   ;;  %vm544_vm7 = vcmask (!%p741_p8), 1043456  }
  0x1b   : > { %758 = vmatpush3.bf16.msra.mxu0 %v341_v6  ;;  %v387_v11 = vunpack.c.0.s8 %v386_v9  ;;  %v453_v31 = vld [vmem:[%s1008_s3] sm:$0x3] (!%p741_p8) }
  0x1c   : > { %769 = vmatprep.subr.mxu0 (!%p741_p8), %v872_v32  ;;  %v742_v34 = vld [vmem:[%s1009_s4] ss:$0 sm:$0xff] (!%p741_p8) }
  0x1d   : > { %v390_v16 = vsub.s32 %v387_v11, %v389_v12  ;;  %v540_v40 = vld [vmem:[%s1010_s5] sm:$0xf] (!%p741_p8) }
  0x1e   : > { %760 = vmatmul.mubr.msk.bf16.vlgmr.msra.gmra.mrb[0].mxu0 %vm335_vm3, %v328_v7 }
  0x1f   : > { %771 = vmatprep.mubr.msk.f32.mxu0 (!%p741_p8), %vm873_vm6, %v872_v32 }
  0x24   : > { %770 = vmatpush3.xpose.msk.msra.mxu0 (!%p741_p8), %vm461_vm5, %v453_v31 }
  0x99   : > { %v333_v13 = vpop.permute.xlu0 %332 }
  0xf1   : > { %v377_v14 = vpop.f32.mrb[0].mxu0 }
  0xf2   : > { %v378_v15 = vadd.f32 %v377_v14, %v333_v13  ;;  %v761_v17 = vpop.f32.mrb[1].mxu0 }
  0xf3   : > { %v380_v18 = vpop.f32.mrb[2].mxu0 }
  0xf4   : > { %v383_v19 = vpack.c.bf16 %v378_v15, %v378_v15  ;;  %v762_v20 = vpop.f32.mrb[3].mxu0 }
  0xf6   : > { %v391_v21 = vrot.slane %v383_v19, %v390_v16  ;;  %v403_v22 = vrot.slane %v383_v19, 2 }
  0xf8   : > { %v398_v23 = vrot.slane %v391_v21, %v390_v16  ;;  %764 = vmatpush3.bf16.xpose.msra.mxu1 %v403_v22 }
  0xf9   : > { %774 = vmatprep.subr.mxu1 (!%p741_p8), %v872_v32 }
  0xfa   : > { %v399_v24 = vcombine.high %v398_v23, %v398_v23 }
  0xfc   : > { %401 = vst [vmem:[%s314_s18] sm:$0x1] %v399_v24 }
  0xff   : > { %766 = vmatmul.mubr.bf16.vlgmr.msra.gmra.mrb[0].mxu1 %v383_v19 }
 0x100   : > { %776 = vmatprep.mubr.msk.f32.mxu1 (!%p741_p8), %vm873_vm6, %v872_v32 }
 0x1cf   : > { %451 = sbr.rel (%p741_p8) target bundleno = 909 (0x38d), region = 52 }
 0x1d2   : > { %v439_v26 = vpop.f32.mrb[0].mxu1 }
 0x1d3   : > { %v445_v27 = vadd.f32 %v439_v26, %v402_v25  ;;  %v767_v28 = vpop.f32.mrb[1].mxu1 }
 0x1d4   : > { %v442_v29 = vpop.f32.mrb[2].mxu1 }
 0x1d5   : > { %447 = vst.msk [vmem:[#allocation2] sm:$0xf] %vm446_vm4, %v445_v27  ;;  %v768_v30 = vpop.f32.mrb[3].mxu1 }
 0x1dc   : > { %v452_v33 = vld [vmem:[#allocation2] sm:$0xf] }
 0x1dd   : > { %772 = vmatmul.mubr.msk.f32.vlgmr.msra.gmra.mrb[0].mxu0 %vm461_vm5, %v452_v33 }
 0x2b0   : > { %v534_v35 = vpop.f32.mrb[0].mxu0 }
 0x2b1   : > { %v535_v36 = vadd.f32 %v742_v34, %v534_v35  ;;  %v773_v37 = vpop.f32.mrb[1].mxu0 }
 0x2b3   : > { %v538_v38 = vadd.f32 %v535_v36, %v452_v33 }
 0x2b5   : > { %v539_v39 = vmax.f32 %v538_v38, 0.0 }
 0x2b7   : > { %775 = vmatpush3.msk.msra.mxu1 %vm544_vm7, %v539_v39 }
 0x2b8   : > { %777 = vmatmul.mubr.msk.f32.vlgmr.msra.gmra.mrb[0].mxu1 %vm335_vm3, %v540_v40 }
 0x38b   : > { %v614_v41 = vpop.f32.mrb[0].mxu1 }
 0x38c   : > { %618 = vst.msk [vmem:[%s953_s14] sm:$0xf] %vm446_vm4, %v614_v41  ;;  %v778_v42 = vpop.f32.mrb[1].mxu1 }
 0x38d PF: > { %s18_s28 = sadd.s32 1, %s865_s28   ;;  %s1013_s24 = smov %s857_s26 }
 0x38e   : > { %p15_p9 = scmp.ge.s32.totalorder %s18_s28, 6   ;;  %s1014_s25 = smov %s861_s27 }
 0x38f   : > { %s1015_s26 = smov %s1018_s29  ;;  %s1016_s27 = smov %s1022_s30 }
 0x390   :  { %17 = sbr.rel (!%p15_p9) target bundleno = 3 (0x3), region = 94 }

</bundles_post_ra>
